<compile_context>
chip_gen: v7x
topology: tpu7x:2x2x1
jax: 0.10.0
libtpu: 0.0.40
codegen_flags: <defaults>
</compile_context>

<pallas_src>
import jax
import jax.numpy as jnp
from jax.experimental import pallas as pl
from jax.experimental.pallas import tpu as pltpu


# ---------------------------------------------------------------------------
# Kernels
# ---------------------------------------------------------------------------

def _matvec_kernel(x_ref, w_ref, b_ref, o_ref, acc_ref):
    """output_class == 1 path, lane-dense output block.

    x: (TM, TK)  w: (TK, 1)  b: (1, 1)  o: (1, 1, TM)  acc: (TM, 1) f32
    """
    k = pl.program_id(1)

    @pl.when(k == 0)
    def _():
        acc_ref[...] = jnp.zeros_like(acc_ref)

    acc_ref[...] += jnp.dot(x_ref[...], w_ref[...],
                            preferred_element_type=jnp.float32)   # MXU

    @pl.when(k == pl.num_programs(1) - 1)
    def _():
        res = acc_ref[...] + b_ref[...]                 # (TM, 1)
        row = jnp.transpose(res)                        # (1, TM)  XLU relayout
        o_ref[...] = row[None].astype(o_ref.dtype)      # (1, 1, TM) full-lane vst


def _linear_kernel(x_ref, w_ref, b_ref, o_ref, acc_ref):
    """General output_class > 1 path.

    x: (TM, TK)  w: (TK, C)  b: (1, C)  o: (TM, C)  acc: (TM, C) f32
    """
    k = pl.program_id(1)

    @pl.when(k == 0)
    def _():
        acc_ref[...] = jnp.zeros_like(acc_ref)

    acc_ref[...] += jnp.dot(x_ref[...], w_ref[...],
                            preferred_element_type=jnp.float32)

    @pl.when(k == pl.num_programs(1) - 1)
    def _():
        o_ref[...] = (acc_ref[...] + b_ref[...]).astype(o_ref.dtype)


# ---------------------------------------------------------------------------
# Tiling plan
# ---------------------------------------------------------------------------

def _round_down(x, m):
    return (x // m) * m


def _round_up(x, m):
    return ((x + m - 1) // m) * m


def _plan_tiles(n, f, c):
    """Pick (tm, tk, vmem_limit_bytes), generation-aware."""
    dtype_bytes = 4
    try:
        vmem_cap = int(pltpu.get_tpu_info().vmem_capacity_bytes)
    except Exception:
        vmem_cap = 64 * 1024 * 1024            # conservative (v7x per-TC)

    if vmem_cap >= 96 * 1024 * 1024:           # v5e / v6e: 128 MiB physical
        vmem_limit = 64 * 1024 * 1024
        budget = 48 * 1024 * 1024
    else:                                      # v7x: 64 MiB per TensorCore
        vmem_limit = 32 * 1024 * 1024
        budget = 26 * 1024 * 1024

    out_cols = 1 if c == 1 else c              # lane-dense (1,1,TM) path stores 1 f32/row

    def raw_tm(tk):
        # weight block (tk, c) is double-buffered by the pipeline; bias tiny.
        resident = 2 * tk * c * dtype_bytes + 2 * max(c, 128) * dtype_bytes
        resident += 512 * 1024                 # Mosaic internal scratch headroom
        per_row = (2 * tk                      # x tile, double-buffered
                   + 2 * out_cols              # output block, double-buffered
                   + c                         # f32 accumulator scratch
                   ) * dtype_bytes
        return max((budget - resident) // per_row, 0)

    # 1) Prefer no K split: weight fully resident, single pass over x.
    tk, tm = f, raw_tm(f)

    # 2) If that forces a tiny batch tile, split the feature dim instead
    #    (exact divisors only -> no garbage in K edge blocks).
    if tm < 256:
        best_tm, best_tk = tm, f
        for cand in (4096, 2048, 1024, 512, 256, 128):
            if cand < f and f % cand == 0:
                t = raw_tm(cand)
                if t > best_tm:
                    best_tm, best_tk = t, cand
                if t >= 512:                   # largest tk reaching the target
                    break
        tm, tk = best_tm, best_tk

    tm = max(tm, 8)
    tm = min(tm, 2048)

    if tm >= n:
        if n >= 256:
            # Megacore: never leave the second TensorCore idle on big batches.
            tm = _round_up(-(-n // 2), 128)    # >= 2 tiles, still <= n
        else:
            tm = n                             # single block == full array dim
    elif tm >= 512:
        tm = _round_down(tm, 512)
    elif tm >= 128:
        tm = _round_down(tm, 128)
    else:
        tm = max(_round_down(tm, 8), 8)

    return tm, tk, vmem_limit


# ---------------------------------------------------------------------------
# Wrapper
# ---------------------------------------------------------------------------

def iclassifier_forward(feats, weight, bias):
    """feats:  (N, C, H, W) float32 (torch NCHW layout)
    weight: (feature_size, output_class)  -- transpose of torch fc.weight
    bias:   (output_class,)
    Returns (N,) if output_class == 1, else (N, output_class)  [torch .squeeze(1)]
    """
    n = feats.shape[0]
    x = feats.reshape(n, -1)                   # torch .view(N, -1)
    f = x.shape[1]
    c = weight.shape[1]
    b2d = bias.reshape(1, c).astype(jnp.float32)

    tm, tk, vmem_limit = _plan_tiles(n, f, c)
    num_m = pl.cdiv(n, tm)
    num_k = f // tk                            # tk divides f by construction

    weight_reads = num_m if num_k > 1 else 1
    cost = pl.CostEstimate(
        flops=2 * n * f * c,
        transcendentals=0,
        bytes_accessed=4 * (n * f + weight_reads * f * c + n * c),
    )
    cparams = pltpu.CompilerParams(
        dimension_semantics=("parallel", "arbitrary"),
        vmem_limit_bytes=vmem_limit,
    )

    if c == 1:
        out3d = pl.pallas_call(
            _matvec_kernel,
            out_shape=jax.ShapeDtypeStruct((num_m, 1, tm), jnp.float32),
            grid_spec=pltpu.PrefetchScalarGridSpec(
                num_scalar_prefetch=0,
                grid=(num_m, num_k),
                in_specs=[
                    pl.BlockSpec((tm, tk), lambda i, k: (i, k)),   # streamed x
                    pl.BlockSpec((tk, 1), lambda i, k: (k, 0)),    # weight
                    pl.BlockSpec((1, 1), lambda i, k: (0, 0)),     # bias
                ],
                out_specs=pl.BlockSpec((1, 1, tm), lambda i, k: (i, 0, 0)),
                scratch_shapes=[pltpu.VMEM((tm, 1), jnp.float32)],
            ),
            compiler_params=cparams,
            cost_estimate=cost,
        )(x, weight, b2d)
        # (num_m, 1, tm) -> flat -> drop padded tail rows.
        return out3d.reshape(num_m * tm)[:n]

    out = pl.pallas_call(
        _linear_kernel,
        out_shape=jax.ShapeDtypeStruct((n, c), jnp.float32),
        grid_spec=pltpu.PrefetchScalarGridSpec(
            num_scalar_prefetch=0,
            grid=(num_m, num_k),
            in_specs=[
                pl.BlockSpec((tm, tk), lambda i, k: (i, k)),
                pl.BlockSpec((tk, c), lambda i, k: (k, 0)),
                pl.BlockSpec((1, c), lambda i, k: (0, 0)),
            ],
            out_specs=pl.BlockSpec((tm, c), lambda i, k: (i, 0)),
            scratch_shapes=[pltpu.VMEM((tm, c), jnp.float32)],
        ),
        compiler_params=cparams,
        cost_estimate=cost,
    )(x, weight, b2d)
    return out  # torch .squeeze(1) is a no-op when output_class > 1


if __name__ == "__main__":
    # Small shapes consistent with the module: feats (N, C, H, W),
    # feature_size = C*H*W.
    N, C, H, W = 8, 2, 4, 4
    feature_size = C * H * W          # 32

    key = jax.random.PRNGKey(0)
    k_feats, k_w, k_b = jax.random.split(key, 3)
    feats = jax.random.normal(k_feats, (N, C, H, W), dtype=jnp.float32)

    # ---- output_class == 1 (squeeze(1) actually fires) -------------------
    output_class = 1
    bound = 1.0 / (feature_size ** 0.5)
    weight = jax.random.uniform(k_w, (feature_size, output_class),
                                minval=-bound, maxval=bound, dtype=jnp.float32)
    bias = jax.random.uniform(k_b, (output_class,),
                              minval=-bound, maxval=bound, dtype=jnp.float32)

    out = iclassifier_forward(feats, weight, bias)
    jax.block_until_ready(out)
    ref = (feats.reshape(N, -1) @ weight + bias).reshape(N)
    assert out.shape == ref.shape, (out.shape, ref.shape)
    assert jnp.allclose(out, ref, atol=1e-5, rtol=1e-5)

    # ---- output_class > 1 (squeeze(1) is a no-op) -------------------------
    output_class2 = 3
    weight2 = jax.random.uniform(k_w, (feature_size, output_class2),
                                 minval=-bound, maxval=bound, dtype=jnp.float32)
    bias2 = jax.random.uniform(k_b, (output_class2,),
                               minval=-bound, maxval=bound, dtype=jnp.float32)

    out2 = iclassifier_forward(feats, weight2, bias2)
    jax.block_until_ready(out2)
    ref2 = feats.reshape(N, -1) @ weight2 + bias2
    assert out2.shape == ref2.shape, (out2.shape, ref2.shape)
    assert jnp.allclose(out2, ref2, atol=1e-5, rtol=1e-5)

    print("KERNEL_OK")
</pallas_src>

<mosaic_0001>
module attributes {stable_mosaic.version = 11 : i64} {
  func.func @_matvec_kernel(%arg0: i32, %arg1: i32, %arg2: memref<8x32xf32, #tpu.memory_space<vmem>>, %arg3: memref<32x1xf32, #tpu.memory_space<vmem>>, %arg4: memref<1x1xf32, #tpu.memory_space<vmem>>, %arg5: memref<1x1x8xf32, #tpu.memory_space<vmem>>, %arg6: memref<8x1xf32, #tpu.memory_space<vmem>>) attributes {dimension_semantics = [#tpu.dimension_semantics<parallel>, #tpu.dimension_semantics<arbitrary>], iteration_bounds = array<i64: 1, 1>, scalar_prefetch = 0 : i64, scratch_operands = 1 : i64, tpu.core_type = #tpu.core_type<tc>, window_params = [{transform_indices = @transform_0, window_bounds = array<i64: 8, 32>}, {transform_indices = @transform_1, window_bounds = array<i64: 32, 1>}, {pipeline_mode = #tpu.pipeline_mode<synchronous>, transform_indices = @transform_2, window_bounds = array<i64: 1, 1>}, {transform_indices = @transform_3, window_bounds = array<i64: 1, 1, 8>}]} {
    %c0_i32 = arith.constant 0 : i32
    %0 = arith.cmpi eq, %arg1, %c0_i32 : i32
    %1 = arith.extui %0 : i1 to i32
    %c0_i32_0 = arith.constant 0 : i32
    %2 = arith.cmpi ne, %1, %c0_i32_0 : i32
    scf.if %2 {
      %cst_10 = arith.constant 0.000000e+00 : f32
      %12 = vector.broadcast %cst_10 : f32 to vector<8x1xf32>
      %c0_11 = arith.constant 0 : index
      %c0_12 = arith.constant 0 : index
      %13 = vector.load %arg6[%c0_11, %c0_12] : memref<8x1xf32, #tpu.memory_space<vmem>>, vector<8x1xf32>
      tpu.vector_store %arg6[%c0_11, %c0_12], %12 {strides = array<i32>} : memref<8x1xf32, #tpu.memory_space<vmem>>, vector<8x1xf32>,
    } else {
    }
    %c0 = arith.constant 0 : index
    %c0_1 = arith.constant 0 : index
    %3 = vector.load %arg6[%c0, %c0_1] : memref<8x1xf32, #tpu.memory_space<vmem>>, vector<8x1xf32>
    %c0_2 = arith.constant 0 : index
    %c0_3 = arith.constant 0 : index
    %4 = vector.load %arg2[%c0_2, %c0_3] : memref<8x32xf32, #tpu.memory_space<vmem>>, vector<8x32xf32>
    %c0_4 = arith.constant 0 : index
    %c0_5 = arith.constant 0 : index
    %5 = vector.load %arg3[%c0_4, %c0_5] : memref<32x1xf32, #tpu.memory_space<vmem>>, vector<32x1xf32>
    %cst = arith.constant dense<0.000000e+00> : vector<8x1xf32>
    %6 = tpu.matmul %4, %5, %cst {dimension_numbers = #tpu.dot_dimension_numbers<[1], [0], [0], [1], [0, 0, 1, 1], [], []>} : vector<8x32xf32>, vector<32x1xf32>, vector<8x1xf32> -> vector<8x1xf32>
    %7 = arith.addf %3, %6 : vector<8x1xf32>
    %c0_6 = arith.constant 0 : index
    %c0_7 = arith.constant 0 : index
    %8 = vector.load %arg6[%c0_6, %c0_7] : memref<8x1xf32, #tpu.memory_space<vmem>>, vector<8x1xf32>
    tpu.vector_store %arg6[%c0_6, %c0_7], %7 {strides = array<i32>} : memref<8x1xf32, #tpu.memory_space<vmem>>, vector<8x1xf32>,
    %c0_i32_8 = arith.constant 0 : i32
    %9 = arith.cmpi eq, %arg1, %c0_i32_8 : i32
    %10 = arith.extui %9 : i1 to i32
    %c0_i32_9 = arith.constant 0 : i32
    %11 = arith.cmpi ne, %10, %c0_i32_9 : i32
    scf.if %11 {
      %c0_10 = arith.constant 0 : index
      %c0_11 = arith.constant 0 : index
      %12 = vector.load %arg6[%c0_10, %c0_11] : memref<8x1xf32, #tpu.memory_space<vmem>>, vector<8x1xf32>
      %c0_12 = arith.constant 0 : index
      %c0_13 = arith.constant 0 : index
      %13 = vector.load %arg4[%c0_12, %c0_13] : memref<1x1xf32, #tpu.memory_space<vmem>>, vector<1x1xf32>
      %14 = vector.broadcast %13 : vector<1x1xf32> to vector<8x1xf32>
      %15 = arith.addf %12, %14 : vector<8x1xf32>
      %16 = tpu.transpose %15, [1, 0] : vector<8x1xf32> -> vector<1x8xf32>
      %17 = vector.shape_cast %16 : vector<1x8xf32> to vector<1x1x8xf32>
      %c0_14 = arith.constant 0 : index
      %c0_15 = arith.constant 0 : index
      %c0_16 = arith.constant 0 : index
      %18 = vector.load %arg5[%c0_14, %c0_15, %c0_16] : memref<1x1x8xf32, #tpu.memory_space<vmem>>, vector<1x1x8xf32>
      tpu.vector_store %arg5[%c0_14, %c0_15, %c0_16], %17 {strides = array<i32>} : memref<1x1x8xf32, #tpu.memory_space<vmem>>, vector<1x1x8xf32>,
    } else {
    }
    return
  }
  func.func @transform_0(%arg0: i32, %arg1: i32) -> (i32, i32) {
    %c0_i32 = arith.constant 0 : i32
    return %arg0, %arg1 : i32, i32
  }
  func.func @transform_1(%arg0: i32, %arg1: i32) -> (i32, i32) {
    %c0_i32 = arith.constant 0 : i32
    %c0_i32_0 = arith.constant 0 : i32
    return %arg1, %c0_i32 : i32, i32
  }
  func.func @transform_2(%arg0: i32, %arg1: i32) -> (i32, i32) {
    %c0_i32 = arith.constant 0 : i32
    %c0_i32_0 = arith.constant 0 : i32
    %c0_i32_1 = arith.constant 0 : i32
    return %c0_i32, %c0_i32_0 : i32, i32
  }
  func.func @transform_3(%arg0: i32, %arg1: i32) -> (i32, i32, i32) {
    %c0_i32 = arith.constant 0 : i32
    %c0_i32_0 = arith.constant 0 : i32
    %c0_i32_1 = arith.constant 0 : i32
    return %arg0, %c0_i32, %c0_i32_0 : i32, i32, i32
  }
}

</mosaic_0001>

<bundles_post_ra>
// kernel: tpu_custom_call.1
= control target key start
LH: loop header
LB: loop body
LE: loop exit
PB: predicated region body
PF: predicated region fallthrough
CT: control target
= control target key end

     0   :  { %s274_s0 = inlined_call_operand.vmem [shape: f32[8,32], index: 0, kind: input, shape index: {}]   ;;  %s275_s1 = inlined_call_operand.vmem [shape: f32[32,1], index: 1, kind: input, shape index: {}]   ;;  %s276_s2 = inlined_call_operand.<no memory space> [shape: f32[1,1], index: 2, kind: input, shape index: {}]   ;;  %s277_s3 = inlined_call_operand.hbm [shape: f32[1,1,8], index: 3, kind: output, shape index: {}]  }
   0x1   :  { %v8_v0 = vstv %s276_s2 }
   0x2   :  { %9 = vst [vmem:[#allocation3] sm:$0x1] %v8_v0 }
   0x3   :  { %v25_v1 = vld [vmem:[%s275_s1] sm:$0xff]  ;;  %v26_v2 = vld [vmem:[%s275_s1 + $0x8] sm:$0xff]  ;;  %v27_v3 = vld [vmem:[%s275_s1 + $0x10] sm:$0xff]  ;;  %vm21_vm0 = vcmask 7168   ;;  %v218_v4 = vmov 0.0|0.0   ;;  %v219_v7 = vmov 0.0  }
   0x4   :  { %184 = vmatprep.subr.bf16.mxu0 %v218_v4  ;;  %v185_v5 = vpack.c.bf16 %v26_v2, %v25_v1  ;;  %v28_v6 = vld [vmem:[%s275_s1 + $0x18] sm:$0xff]  ;;  %22 = vst.msk [vmem:[#allocation2] sm:$0xff] %vm21_vm0, %v219_v7 }
   0x5   :  { %10 = vsyncpa [#allocation5], 0  ;;  %vm220_vm1 = vmmov 0   ;;  %v188_v8 = vpack.c.bf16 %v28_v6, %v27_v3  ;;  %v24_v9 = vld [vmem:[%s274_s0] sm:$0xff]  ;;  %vm29_vm2 = vcmask 261120   ;;  %s221_s1 = smov [#allocation4]  }
   0x6   :  { %181 = vmatprep.mubr.msk.f32.mxu0 %vm220_vm1, %v219_v7  ;;  %186 = vmatpush3.bf16.msra.mxu0 %v185_v5  ;;  %s158_s23 = sshll.u32 %s221_s1, 4  ;;  %vm150_vm3 = vcmask 57344   ;;  %s159_s23 = int_to_ptr.vmem [resolvable:$true] %s158_s23 }
   0x7   :  { %187 = vmatprep.subr.bf16.mxu0 %v218_v4  ;;  %s194_s24 = scalar_lea.vmem %s159_s23, 16  ;;  %s198_s0 = scalar_lea.vmem %s159_s23, 32 }
   0x8   :  { %p195_p0 = scmp.ne.s32.totalorder %s159_s23, %s194_s24  ;;  %p199_p1 = scmp.lt.s32.totalorder %s159_s23, %s159_s23 }
   0x9   :  { %v167_v14 = vld [vmem:[#allocation3] ss:$0 sm:$0xff]  ;;  %p200_p2 = scmp.lt.s32.totalorder %s198_s0, %s194_s24 }
   0xa   :  { %189 = vmatpush3.bf16.msra.mxu0 %v188_v8 }
   0xb   :  { %v23_v10 = vld [vmem:[#allocation2] sm:$0xff]  ;;  %p201_p3 = por %p200_p2, %p199_p1 }
   0xd   :  { %182 = vmatmul.mubr.msk.f32.vlgmr.msra.gmra.mrb[0].mxu0 %vm29_vm2, %v24_v9  ;;  %p202_p4 = pnand %p201_p3, %p195_p0 }
  0xe0   :  { %v99_v11 = vpop.f32.mrb[0].mxu0 }
  0xe1   :  { %v103_v12 = vadd.f32 %v99_v11, %v23_v10  ;;  %v183_v13 = vpop.f32.mrb[1].mxu0 }
  0xe3   :  { %105 = vst.msk [vmem:[#allocation2] sm:$0xff] %vm21_vm0, %v103_v12 }
  0xea   :  { %v109_v15 = vld [vmem:[#allocation2] sm:$0xff] }
  0xeb   :  { %v117_v16 = vadd.f32 %v167_v14, %v109_v15 }
  0xed   :  { %118 = vxpose.xlu0.b32.start.end [1/1] (short) (narrow) %v117_v16, 8 }
 0x16d   :  { %v134_v17 = vpop.trf.xlu0 }
 0x16e   :  { %151 = vst.msk [vmem:[#allocation4] sm:$0x1] %vm150_vm3, %v134_v17 }
 0x16f   :  { %205 = shalt.err (!%p202_p4)
}
 0x170   :  { %s206_s27 = scalar_lea.hbm %s277_s3, 16 }
 0x171   :  { %p207_p5 = scmp.ne.s32.totalorder %s277_s3, %s206_s27  ;;  %p210_p6 = scmp.lt.u32.totalorder %s206_s27, %s277_s3 }
 0x173   :  { %p212_p7 = pnand %p210_p6, %p207_p5 }
 0x175   :  { %215 = shalt.err (!%p212_p7)
}
 0x176   :  { %161 = dma.vmem_to_hbm [thread:$0]  %s159_s23, 16, %s277_s3, [#allocation5]  }
 0x177   :  { %216 = dma.done.wait [#allocation5], 16  }
 0x178   :  { %217 = vsyncadd [#allocation5], 4294967280 }
 0x179   :  { %165 = vsyncpa [#allocation5], 1 }

</bundles_post_ra>
